<compile_context>
chip_gen: v7x
topology: tpu7x:2x2x1
jax: 0.10.0
libtpu: 0.0.40
codegen_flags: <defaults>
</compile_context>

<pallas_src>
import functools

import jax
import jax.numpy as jnp
import numpy as np
from jax.experimental import pallas as pl
from jax.experimental.pallas import tpu as pltpu

EPS = 1e-5      # nn.BatchNorm2d default eps
ALPHA = 0.2     # LeakyReLU negative slope


def _round_up(x, m):
    return (x + m - 1) // m * m


def _vmem_limit_bytes():
    """Generation-aware scoped-VMEM budget (v7x: 64 MiB phys, v5e/v6e: 128 MiB)."""
    cap = None
    try:
        cap = int(getattr(pltpu.get_tpu_info(), "vmem_capacity_bytes", 0)) or None
    except Exception:
        cap = None
    if cap is None:
        return 40 * 1024 * 1024                    # conservative: fits v7x
    return min((cap * 5) // 8, 96 * 1024 * 1024)   # v7x: 40 MiB, v5e/v6e: 80 MiB


# ---------------------------------------------------------------------------
# Pass 1: transposed im2col GEMM (bf16 operands, f32 MXU accumulate) +
# per-tile BatchNorm partial statistics.  Grid axis is fully parallel.
# ---------------------------------------------------------------------------
def _conv_stats_kernel(cols_ref, w_ref, conv_ref, psum_ref, psq_ref):
    # (Cp8, K) @ (K, tm) -> (Cp8, tm) f32: channels on sublanes, M on lanes.
    acc = jnp.dot(w_ref[...], cols_ref[...], preferred_element_type=jnp.float32)
    conv_ref[...] = acc
    # Per-channel partials for this M tile (lane reduction).
    psum_ref[0] = jnp.sum(acc, axis=1, keepdims=True)
    psq_ref[0] = jnp.sum(acc * acc, axis=1, keepdims=True)


# ---------------------------------------------------------------------------
# Pass 2: in-place per-channel scale/shift + LeakyReLU (aliased with `conv`).
# ---------------------------------------------------------------------------
def _bn_lrelu_kernel(conv_ref, scale_ref, shift_ref, out_ref, *, alpha):
    y = conv_ref[...] * scale_ref[...] + shift_ref[...]
    out_ref[...] = jnp.maximum(y, alpha * y).astype(out_ref.dtype)


@functools.partial(jax.jit, static_argnames=("stride", "padding", "alpha", "tile_m"))
def d_block_forward(x_nchw, w_pt, gamma, beta, stride=2, padding=1,
                    alpha=ALPHA, tile_m=None):
    """Forward of D_block.  w_pt has PyTorch Conv2d layout [Cout, Cin, KH, KW]."""
    N, Cin, H, W = x_nchw.shape
    Cout, Cin_w, KH, KW = w_pt.shape
    assert Cin == Cin_w
    s, p = stride, padding
    Ho = (H + 2 * p - KH) // s + 1
    Wo = (W + 2 * p - KW) // s + 1

    M = N * Ho * Wo
    K = Cin * KH * KW
    Kp = _round_up(K, 8)        # sublane-aligned contraction dim (no 128 pad)
    Cp = _round_up(Cout, 8)     # channels on sublanes: pad to 8, not 128

    vmem_limit = _vmem_limit_bytes()

    if tile_m is None:
        # Size the lane tile from the VMEM budget (cols block is double-buffered).
        budget = max(vmem_limit // 4, 1 << 20)
        tm = (budget // (2 * Kp * 2)) // 128 * 128
        tm = int(min(max(tm, 256), 2048))
    else:
        tm = max(128, _round_up(int(tile_m), 128))
    tm = min(tm, _round_up(M, 128))
    Mp = _round_up(M, tm)
    nm = Mp // tm

    # --- host glue: K-major im2col (bf16) + weight reshape -------------------
    xq = jnp.pad(x_nchw, ((0, 0), (0, 0), (p, p), (p, p))).astype(jnp.bfloat16)
    slices = [xq[:, :, kh:kh + s * Ho:s, kw:kw + s * Wo:s]        # (N,Cin,Ho,Wo)
              for kh in range(KH) for kw in range(KW)]
    patches = jnp.stack(slices, axis=2)                           # (N,Cin,KH*KW,Ho,Wo)
    colsT = jnp.transpose(patches, (1, 2, 0, 3, 4)).reshape(K, M)  # (K, M)
    colsT = jnp.pad(colsT, ((0, Kp - K), (0, Mp - M)))            # zero pad -> no bias
    wmat = jnp.pad(w_pt.astype(jnp.bfloat16).reshape(Cout, K),
                   ((0, Cp - Cout), (0, Kp - K)))                 # (Cp, Kp)

    # --- pass 1: GEMM + per-tile BN partial statistics (fully parallel) ------
    conv, psum, psq = pl.pallas_call(
        _conv_stats_kernel,
        out_shape=(jax.ShapeDtypeStruct((Cp, Mp), jnp.float32),
                   jax.ShapeDtypeStruct((nm, Cp, 1), jnp.float32),
                   jax.ShapeDtypeStruct((nm, Cp, 1), jnp.float32)),
        grid_spec=pltpu.PrefetchScalarGridSpec(
            num_scalar_prefetch=0,
            grid=(nm,),
            in_specs=[
                pl.BlockSpec((Kp, tm), lambda i: (0, i)),
                pl.BlockSpec((Cp, Kp), lambda i: (0, 0),
                             pipeline_mode=pl.Buffered(1)),       # weight: no dbl-buf
            ],
            out_specs=[
                pl.BlockSpec((Cp, tm), lambda i: (0, i)),
                pl.BlockSpec((1, Cp, 1), lambda i: (i, 0, 0)),
                pl.BlockSpec((1, Cp, 1), lambda i: (i, 0, 0)),
            ],
        ),
        compiler_params=pltpu.CompilerParams(
            dimension_semantics=("parallel",),                    # megacore-shardable
            vmem_limit_bytes=vmem_limit),
        cost_estimate=pl.CostEstimate(
            flops=2 * Mp * Kp * Cp + 3 * Mp * Cp,
            transcendentals=0,
            bytes_accessed=Mp * Kp * 2 + Cp * Kp * 2 + Mp * Cp * 4 + 2 * nm * Cp * 4),
    )(colsT, wmat)

    # --- tiny fold in plain JAX: batch statistics -> per-channel scale/shift --
    # TODO(synk): E[x^2]-E[x]^2 in f32 is cancellation-prone for very large M;
    # a mean-shifted / Welford fold of the per-tile partials would be sturdier.
    sums = jnp.sum(psum[:, :, 0], axis=0)                         # (Cp,)
    sqs = jnp.sum(psq[:, :, 0], axis=0)
    mean = sums / M                                               # real M, not padded
    var = jnp.maximum(sqs / M - mean * mean, 0.0)
    gamma_p = jnp.pad(gamma.astype(jnp.float32), (0, Cp - Cout))
    beta_p = jnp.pad(beta.astype(jnp.float32), (0, Cp - Cout))
    scale = gamma_p * jax.lax.rsqrt(var + EPS)
    shift = beta_p - mean * scale
    scale = scale.reshape(Cp, 1)
    shift = shift.reshape(Cp, 1)

    # --- pass 2: in-place scale/shift + LeakyReLU (aliased with `conv`) -------
    tm2 = tm
    while tm2 * 2 <= 4096 and Mp % (tm2 * 2) == 0:                # larger streaming tile
        tm2 *= 2
    nm2 = Mp // tm2

    outT = pl.pallas_call(
        functools.partial(_bn_lrelu_kernel, alpha=alpha),
        out_shape=jax.ShapeDtypeStruct((Cp, Mp), jnp.float32),
        grid_spec=pltpu.PrefetchScalarGridSpec(
            num_scalar_prefetch=0,
            grid=(nm2,),
            in_specs=[
                pl.BlockSpec((Cp, tm2), lambda i: (0, i)),
                pl.BlockSpec((Cp, 1), lambda i: (0, 0),
                             pipeline_mode=pl.Buffered(1)),
                pl.BlockSpec((Cp, 1), lambda i: (0, 0),
                             pipeline_mode=pl.Buffered(1)),
            ],
            out_specs=pl.BlockSpec((Cp, tm2), lambda i: (0, i)),
        ),
        compiler_params=pltpu.CompilerParams(
            dimension_semantics=("parallel",),
            vmem_limit_bytes=vmem_limit),
        cost_estimate=pl.CostEstimate(
            flops=3 * Mp * Cp,
            transcendentals=0,
            bytes_accessed=2 * Mp * Cp * 4 + 2 * Cp * 4),
        input_output_aliases={0: 0},                              # epilogue in place
    )(conv, scale, shift)

    # Channel-major -> NCHW is a leading-axis permute (last two dims untouched).
    out = outT[:Cout, :M].reshape(Cout, N, Ho, Wo)
    return jnp.transpose(out, (1, 0, 2, 3))


def d_block_reference(x_nchw, w_pt, gamma, beta, stride=2, padding=1,
                      alpha=ALPHA):
    """Pure-JAX reference (same math as PyTorch D_block in training mode)."""
    conv = jax.lax.conv_general_dilated(
        x_nchw, w_pt,
        window_strides=(stride, stride),
        padding=((padding, padding), (padding, padding)),
        dimension_numbers=("NCHW", "OIHW", "NCHW"))
    mean = jnp.mean(conv, axis=(0, 2, 3), keepdims=True)
    var = jnp.mean((conv - mean) ** 2, axis=(0, 2, 3), keepdims=True)
    xhat = (conv - mean) * jax.lax.rsqrt(var + EPS)
    y = xhat * gamma.reshape(1, -1, 1, 1) + beta.reshape(1, -1, 1, 1)
    return jnp.where(y > 0, y, alpha * y)


if __name__ == "__main__":
    root = jax.random.PRNGKey(0)

    def run_case(case_id, N, Cin, H, W, Cout, tile_m):
        kx, kw = jax.random.split(jax.random.fold_in(root, case_id), 2)
        x = jax.random.normal(kx, (N, Cin, H, W), jnp.float32)
        # Conv2d weight: [out_channels, in_channels, kH, kW], bias=False
        w = 0.1 * jax.random.normal(kw, (Cout, Cin, 4, 4), jnp.float32)
        # BatchNorm2d affine params (deterministic, non-trivial)
        gamma = 1.0 + 0.1 * jnp.arange(Cout, dtype=jnp.float32)
        beta = 0.05 * jnp.arange(Cout, dtype=jnp.float32)

        out = d_block_forward(x, w, gamma, beta, tile_m=tile_m)
        out = jax.block_until_ready(out)

        # Reference uses the same bf16-quantized GEMM operands (the MXU
        # accumulates in f32 either way) so the comparison isolates kernel math.
        xq = x.astype(jnp.bfloat16).astype(jnp.float32)
        wq = w.astype(jnp.bfloat16).astype(jnp.float32)
        ref = d_block_reference(xq, wq, gamma, beta)
        np.testing.assert_allclose(np.asarray(out), np.asarray(ref),
                                   rtol=5e-4, atol=5e-4)

    # Module-consistent small shape: N=2, Cin=4, 16x16 -> 8x8, Cout=8 (1 M tile).
    run_case(0, 2, 4, 16, 16, 8, tile_m=128)
    # Slightly larger spatial size: M=512 -> 4 tiles, exercises the multi-tile
    # partial-stats fold and the pass-2 tile scale-up path.
    run_case(1, 2, 4, 32, 32, 8, tile_m=128)

    print("KERNEL_OK")
</pallas_src>

<mosaic_0001>
module attributes {stable_mosaic.version = 11 : i64} {
  func.func @_conv_stats_kernel(%arg0: i32, %arg1: memref<64x128xbf16, #tpu.memory_space<vmem>>, %arg2: memref<8x64xbf16, #tpu.memory_space<vmem>>, %arg3: memref<8x128xf32, #tpu.memory_space<vmem>>, %arg4: memref<1x8x1xf32, #tpu.memory_space<vmem>>, %arg5: memref<1x8x1xf32, #tpu.memory_space<vmem>>) attributes {dimension_semantics = [#tpu.dimension_semantics<parallel>], iteration_bounds = array<i64: 1>, scalar_prefetch = 0 : i64, scratch_operands = 0 : i64, tpu.core_type = #tpu.core_type<tc>, window_params = [{transform_indices = @transform_0, window_bounds = array<i64: 64, 128>}, {pipeline_mode = #tpu.pipeline_mode<synchronous>, transform_indices = @transform_1, window_bounds = array<i64: 8, 64>}, {transform_indices = @transform_2, window_bounds = array<i64: 8, 128>}, {transform_indices = @transform_3, window_bounds = array<i64: 1, 8, 1>}, {transform_indices = @transform_4, window_bounds = array<i64: 1, 8, 1>}]} {
    %c0 = arith.constant 0 : index
    %c0_0 = arith.constant 0 : index
    %0 = vector.load %arg2[%c0, %c0_0] : memref<8x64xbf16, #tpu.memory_space<vmem>>, vector<8x64xbf16>
    %c0_1 = arith.constant 0 : index
    %c0_2 = arith.constant 0 : index
    %1 = vector.load %arg1[%c0_1, %c0_2] : memref<64x128xbf16, #tpu.memory_space<vmem>>, vector<64x128xbf16>
    %cst = arith.constant dense<0.000000e+00> : vector<8x128xf32>
    %2 = tpu.matmul %0, %1, %cst {dimension_numbers = #tpu.dot_dimension_numbers<[1], [0], [0], [1], [0, 0, 1, 1], [], []>} : vector<8x64xbf16>, vector<64x128xbf16>, vector<8x128xf32> -> vector<8x128xf32>
    %c0_3 = arith.constant 0 : index
    %c0_4 = arith.constant 0 : index
    %3 = vector.load %arg3[%c0_3, %c0_4] : memref<8x128xf32, #tpu.memory_space<vmem>>, vector<8x128xf32>
    tpu.vector_store %arg3[%c0_3, %c0_4], %2 {strides = array<i32>} : memref<8x128xf32, #tpu.memory_space<vmem>>, vector<8x128xf32>,
    %cst_5 = arith.constant dense<0.000000e+00> : vector<8xf32>
    %4 = vector.multi_reduction <add>, %2, %cst_5 [1] : vector<8x128xf32> to vector<8xf32>
    %5 = vector.shape_cast %4 : vector<8xf32> to vector<8x1xf32>
    %c0_6 = arith.constant 0 : index
    %c0_7 = arith.constant 0 : index
    %c0_8 = arith.constant 0 : index
    %6 = vector.load %arg4[%c0_6, %c0_7, %c0_8] : memref<1x8x1xf32, #tpu.memory_space<vmem>>, vector<1x8x1xf32>
    %7 = vector.shape_cast %6 : vector<1x8x1xf32> to vector<8x1xf32>
    %8 = vector.shape_cast %5 : vector<8x1xf32> to vector<1x8x1xf32>
    tpu.vector_store %arg4[%c0_6, %c0_7, %c0_8], %8 {strides = array<i32>} : memref<1x8x1xf32, #tpu.memory_space<vmem>>, vector<1x8x1xf32>,
    %9 = arith.mulf %2, %2 : vector<8x128xf32>
    %cst_9 = arith.constant dense<0.000000e+00> : vector<8xf32>
    %10 = vector.multi_reduction <add>, %9, %cst_9 [1] : vector<8x128xf32> to vector<8xf32>
    %11 = vector.shape_cast %10 : vector<8xf32> to vector<8x1xf32>
    %c0_10 = arith.constant 0 : index
    %c0_11 = arith.constant 0 : index
    %c0_12 = arith.constant 0 : index
    %12 = vector.load %arg5[%c0_10, %c0_11, %c0_12] : memref<1x8x1xf32, #tpu.memory_space<vmem>>, vector<1x8x1xf32>
    %13 = vector.shape_cast %12 : vector<1x8x1xf32> to vector<8x1xf32>
    %14 = vector.shape_cast %11 : vector<8x1xf32> to vector<1x8x1xf32>
    tpu.vector_store %arg5[%c0_10, %c0_11, %c0_12], %14 {strides = array<i32>} : memref<1x8x1xf32, #tpu.memory_space<vmem>>, vector<1x8x1xf32>,
    return
  }
  func.func @transform_0(%arg0: i32) -> (i32, i32) {
    %c0_i32 = arith.constant 0 : i32
    %c0_i32_0 = arith.constant 0 : i32
    return %c0_i32, %arg0 : i32, i32
  }
  func.func @transform_1(%arg0: i32) -> (i32, i32) {
    %c0_i32 = arith.constant 0 : i32
    %c0_i32_0 = arith.constant 0 : i32
    %c0_i32_1 = arith.constant 0 : i32
    return %c0_i32, %c0_i32_0 : i32, i32
  }
  func.func @transform_2(%arg0: i32) -> (i32, i32) {
    %c0_i32 = arith.constant 0 : i32
    %c0_i32_0 = arith.constant 0 : i32
    return %c0_i32, %arg0 : i32, i32
  }
  func.func @transform_3(%arg0: i32) -> (i32, i32, i32) {
    %c0_i32 = arith.constant 0 : i32
    %c0_i32_0 = arith.constant 0 : i32
    %c0_i32_1 = arith.constant 0 : i32
    return %arg0, %c0_i32, %c0_i32_0 : i32, i32, i32
  }
  func.func @transform_4(%arg0: i32) -> (i32, i32, i32) {
    %c0_i32 = arith.constant 0 : i32
    %c0_i32_0 = arith.constant 0 : i32
    %c0_i32_1 = arith.constant 0 : i32
    return %arg0, %c0_i32, %c0_i32_0 : i32, i32, i32
  }
}

module attributes {stable_mosaic.version = 11 : i64} {
  func.func @_bn_lrelu_kernel(%arg0: i32, %arg1: memref<8x128xf32, #tpu.memory_space<vmem>>, %arg2: memref<8x1xf32, #tpu.memory_space<vmem>>, %arg3: memref<8x1xf32, #tpu.memory_space<vmem>>, %arg4: memref<8x128xf32, #tpu.memory_space<vmem>>) attributes {dimension_semantics = [#tpu.dimension_semantics<parallel>], iteration_bounds = array<i64: 1>, scalar_prefetch = 0 : i64, scratch_operands = 0 : i64, tpu.core_type = #tpu.core_type<tc>, window_params = [{transform_indices = @transform_0, window_bounds = array<i64: 8, 128>}, {pipeline_mode = #tpu.pipeline_mode<synchronous>, transform_indices = @transform_1, window_bounds = array<i64: 8, 1>}, {pipeline_mode = #tpu.pipeline_mode<synchronous>, transform_indices = @transform_2, window_bounds = array<i64: 8, 1>}, {transform_indices = @transform_3, window_bounds = array<i64: 8, 128>}]} {
    %c0 = arith.constant 0 : index
    %c0_0 = arith.constant 0 : index
    %0 = vector.load %arg1[%c0, %c0_0] : memref<8x128xf32, #tpu.memory_space<vmem>>, vector<8x128xf32>
    %c0_1 = arith.constant 0 : index
    %c0_2 = arith.constant 0 : index
    %1 = vector.load %arg2[%c0_1, %c0_2] : memref<8x1xf32, #tpu.memory_space<vmem>>, vector<8x1xf32>
    %2 = vector.broadcast %1 : vector<8x1xf32> to vector<8x128xf32>
    %3 = arith.mulf %0, %2 : vector<8x128xf32>
    %c0_3 = arith.constant 0 : index
    %c0_4 = arith.constant 0 : index
    %4 = vector.load %arg3[%c0_3, %c0_4] : memref<8x1xf32, #tpu.memory_space<vmem>>, vector<8x1xf32>
    %5 = vector.broadcast %4 : vector<8x1xf32> to vector<8x128xf32>
    %6 = arith.addf %3, %5 : vector<8x128xf32>
    %cst = arith.constant 2.000000e-01 : f32
    %7 = vector.broadcast %cst : f32 to vector<8x128xf32>
    %8 = arith.mulf %7, %6 : vector<8x128xf32>
    %9 = arith.maximumf %6, %8 : vector<8x128xf32>
    %c0_5 = arith.constant 0 : index
    %c0_6 = arith.constant 0 : index
    %10 = vector.load %arg4[%c0_5, %c0_6] : memref<8x128xf32, #tpu.memory_space<vmem>>, vector<8x128xf32>
    tpu.vector_store %arg4[%c0_5, %c0_6], %9 {strides = array<i32>} : memref<8x128xf32, #tpu.memory_space<vmem>>, vector<8x128xf32>,
    return
  }
  func.func @transform_0(%arg0: i32) -> (i32, i32) {
    %c0_i32 = arith.constant 0 : i32
    %c0_i32_0 = arith.constant 0 : i32
    return %c0_i32, %arg0 : i32, i32
  }
  func.func @transform_1(%arg0: i32) -> (i32, i32) {
    %c0_i32 = arith.constant 0 : i32
    %c0_i32_0 = arith.constant 0 : i32
    %c0_i32_1 = arith.constant 0 : i32
    return %c0_i32, %c0_i32_0 : i32, i32
  }
  func.func @transform_2(%arg0: i32) -> (i32, i32) {
    %c0_i32 = arith.constant 0 : i32
    %c0_i32_0 = arith.constant 0 : i32
    %c0_i32_1 = arith.constant 0 : i32
    return %c0_i32, %c0_i32_0 : i32, i32
  }
  func.func @transform_3(%arg0: i32) -> (i32, i32) {
    %c0_i32 = arith.constant 0 : i32
    %c0_i32_0 = arith.constant 0 : i32
    return %c0_i32, %arg0 : i32, i32
  }
}

</mosaic_0001>

<bundles_post_ra>
// kernel: d_block_forward.3
= control target key start
LH: loop header
LB: loop body
LE: loop exit
PB: predicated region body
PF: predicated region fallthrough
CT: control target
= control target key end

     0   :  { %v38_v0 = vmov 0   ;;  %s71_s1 = inlined_call_operand.vmem [shape: f32[8,1], index: 1, kind: input, shape index: {}]   ;;  %s72_s2 = inlined_call_operand.vmem [shape: f32[8,1], index: 2, kind: input, shape index: {}]   ;;  %s73_s0 = inlined_call_operand.vmem [shape: f32[8,128], index: 0, kind: input, shape index: {}, may-alias: {0,3}]   ;;  %s74_s3 = inlined_call_operand.vmem [shape: f32[8,128], index: 3, kind: output, shape index: {}, may-alias: {0,3}]  }
   0x1   :  { %37 = vset.pattern.permute.xlu0 %v38_v0  ;;  %v15_v1 = vld [vmem:[%s71_s1] sm:$0xff] }
   0x2   :  { %18 = vperm.xlu0 %37, %v15_v1   ;;  %v22_v2 = vld [vmem:[%s72_s2] sm:$0xff] }
   0x3   :  { %v14_v4 = vld [vmem:[%s73_s0] sm:$0xff] }
   0x6   :  { %25 = vperm.xlu0 %37, %v22_v2  }
  0x81   :  { %v19_v3 = vpop.permute.xlu0 %18 }
  0x82   :  { %v21_v5 = vmul.f32 %v19_v3, %v14_v4 }
  0x85   :  { %v26_v6 = vpop.permute.xlu0 %25 }
  0x86   :  { %v28_v7 = vadd.f32 %v26_v6, %v21_v5 }
  0x88   :  { %v29_v8 = vmul.f32 0.2, %v28_v7 }
  0x8a   :  { %v30_v9 = vmax.f32 %v28_v7, %v29_v8 }
  0x8c   :  { %31 = vst [vmem:[%s74_s3] sm:$0xff] %v30_v9 }

// kernel: d_block_forward.2
= control target key start
LH: loop header
LB: loop body
LE: loop exit
PB: predicated region body
PF: predicated region fallthrough
CT: control target
= control target key end

     0   :  { %v141_v0 = vmov 0.0   ;;  %vm142_vm0 = vmmov 0   ;;  %vm48_vm1 = vcmask 523264   ;;  %vm95_vm2 = vcmask 7168   ;;  %s192_s0 = inlined_call_operand.vmem [shape: bf16[64,128], index: 0, kind: input, shape index: {}]   ;;  %s193_s1 = inlined_call_operand.vmem [shape: bf16[8,64], index: 1, kind: input, shape index: {}]   ;;  %s194_s2 = inlined_call_operand.vmem [shape: f32[8,128], index: 2, kind: output, shape index: {0}]   ;;  %s195_s3 = inlined_call_operand.vmem [shape: f32[1,8,1], index: 3, kind: output, shape index: {1}]   ;;  %s196_s4 = inlined_call_operand.vmem [shape: f32[1,8,1], index: 4, kind: output, shape index: {2}]  }
   0x1   :  { %123 = vmatprep.subr.bf16.mxu0 %v141_v0  ;;  %v137_v1 = vld [vmem:[%s192_s0] sm:$0xff]   ;;  %131 = vmatprep.mubr.msk.bf16.mxu0 %vm142_vm0, %v141_v0  ;;  %v138_v2 = vld [vmem:[%s192_s0 + $0x8] sm:$0xff]   ;;  %v139_v3 = vld [vmem:[%s192_s0 + $0x10] sm:$0xff]  }
   0x2   :  { %124 = vmatpush3.bf16.msra.mxu0 %v137_v1  ;;  %v140_v4 = vld [vmem:[%s192_s0 + $0x18] sm:$0xff]   ;;  %v15_v5 = vld [vmem:[%s193_s1] sm:$0xf] }
   0x3   :  { %125 = vmatprep.subr.bf16.mxu0 %v141_v0 }
   0x6   :  { %126 = vmatpush3.bf16.msra.mxu0 %v138_v2 }
   0x7   :  { %127 = vmatprep.subr.bf16.mxu0 %v141_v0 }
   0xa   :  { %128 = vmatpush3.bf16.msra.mxu0 %v139_v3 }
   0xb   :  { %129 = vmatprep.subr.bf16.mxu0 %v141_v0 }
   0xe   :  { %130 = vmatpush3.bf16.msra.mxu0 %v140_v4 }
  0x11   :  { %132 = vmatmul.mubr.msk.bf16.vlgmr.msra.gmra.mrb[0].mxu0 %vm48_vm1, %v15_v5 }
  0xe4   :  { %v86_v6 = vpop.f32.mrb[0].mxu0 }
  0xe5   :  { %92 = vst [vmem:[%s194_s2] sm:$0xff] %v86_v6  ;;  %93 = vadd.xlane.f32.xlu0 %v86_v6  ;;  %v133_v7 = vpop.f32.mrb[1].mxu0  ;;  %v97_v10 = vmul.f32 %v86_v6, %v86_v6 }
  0xe6   :  { %v89_v8 = vpop.f32.mrb[2].mxu0 }
  0xe7   :  { %v134_v9 = vpop.f32.mrb[3].mxu0 }
  0xe9   :  { %98 = vadd.xlane.f32.xlu0 %v97_v10 }
 0x172   :  { %v94_v11 = vpop.xlane.xlu0 %93 }
 0x173   :  { %96 = vst.msk [vmem:[%s195_s3] sm:$0xff] %vm95_vm2, %v94_v11 }
 0x176   :  { %v99_v12 = vpop.xlane.xlu0 %98 }
 0x177   :  { %100 = vst.msk [vmem:[%s196_s4] sm:$0xff] %vm95_vm2, %v99_v12 }

</bundles_post_ra>
